<compile_context>
chip_gen: v6e
topology: v6e:2x2x1
jax: 0.10.0
libtpu: 0.0.40
codegen_flags: <defaults>
</compile_context>

<pallas_src>
import functools

import jax
import jax.numpy as jnp
from jax.experimental import pallas as pl
from jax.experimental.pallas import tpu as pltpu

OUT_PAD = 128  # lane-dense output/weight width (multiple of the 128-lane vreg)


def linear_kernel(x_ref, w_ref, b_ref, o_ref):
    """y = x @ W_t + b, with W_t pre-transposed to (IN, OUT_PAD) bf16."""
    x = x_ref[...].astype(jnp.bfloat16)          # (B, IN)       bf16 MXU input
    acc = jnp.dot(
        x,
        w_ref[...],                              # (IN, OUT_PAD) bf16, lane-dense
        preferred_element_type=jnp.float32,      # f32 accumulate on the MXU
    )                                            # (B, OUT_PAD)  f32
    # f32 bias-add epilogue (keep it f32: v5e VPU has no bf16 arithmetic).
    o_ref[...] = (acc + b_ref[...]).astype(o_ref.dtype)


def init_toy_model_params(weight, bias, out_pad=OUT_PAD):
    """One-time parameter prep (done at model init, never per forward).

    weight: (OUT, IN) float32, native nn.Linear layout.
      -> transposed to (IN, out_pad), zero-padded on OUT, cast to bf16.
    bias:   (OUT,) float32 -> zero-padded, reshaped to (1, out_pad), kept f32.
    """
    out_features, in_features = weight.shape
    w_t = (
        jnp.zeros((in_features, out_pad), jnp.bfloat16)
        .at[:, :out_features]
        .set(weight.T.astype(jnp.bfloat16))
    )
    b_pad = jnp.zeros((1, out_pad), jnp.float32).at[0, :out_features].set(bias)
    return w_t, b_pad


@functools.partial(jax.jit, static_argnames=("out_features",))
def toy_model_forward(x, w_t, b_pad, out_features):
    """ToyModel.forward: nn.Linear(10, 10) on x of shape (B, 10)."""
    batch = x.shape[0]
    out_pad = w_t.shape[1]

    y_pad = pl.pallas_call(
        linear_kernel,
        out_shape=jax.ShapeDtypeStruct((batch, out_pad), jnp.float32),
        # No grid: single invocation, whole (tiny) arrays resident in VMEM —
        # no pipeline / double-buffer bookkeeping for a one-tile problem.
        in_specs=[
            pl.BlockSpec(memory_space=pltpu.MemorySpace.VMEM),  # x
            pl.BlockSpec(memory_space=pltpu.MemorySpace.VMEM),  # weight (IN, OUT_PAD) bf16
            pl.BlockSpec(memory_space=pltpu.MemorySpace.VMEM),  # bias (1, OUT_PAD) f32
        ],
        out_specs=pl.BlockSpec(memory_space=pltpu.MemorySpace.VMEM),
    )(x, w_t, b_pad)

    # Slice back to the 10 valid features for exact nn.Linear semantics.
    # (If the downstream consumer accepts the padded (B, 128) slab, return
    # y_pad directly and drop this extra HLO op / HBM round-trip.)
    return y_pad[:, :out_features]


if __name__ == "__main__":
    key = jax.random.PRNGKey(0)
    k_x, k_w, k_b = jax.random.split(key, 3)

    B, IN, OUT = 8, 10, 10
    x = jax.random.normal(k_x, (B, IN), dtype=jnp.float32)

    # Deterministic init mimicking nn.Linear's uniform(-1/sqrt(in), 1/sqrt(in)).
    bound = 1.0 / (IN ** 0.5)
    weight = jax.random.uniform(k_w, (OUT, IN), minval=-bound, maxval=bound,
                                dtype=jnp.float32)
    bias = jax.random.uniform(k_b, (OUT,), minval=-bound, maxval=bound,
                              dtype=jnp.float32)

    # One-time param prep (transpose + padding + bf16 cast), outside forward.
    w_t, b_pad = init_toy_model_params(weight, bias)

    y = toy_model_forward(x, w_t, b_pad, OUT)
    y = jax.block_until_ready(y)

    # Correctness check against plain-JAX reference of nn.Linear semantics.
    # Tolerance relaxed for bf16 MXU inputs (f32 accumulation).
    y_ref = x @ weight.T + bias
    assert y.shape == (B, OUT)
    assert jnp.allclose(y, y_ref, atol=2e-2, rtol=2e-2), (
        jnp.max(jnp.abs(y - y_ref)))

    print("KERNEL_OK")
</pallas_src>

<mosaic_0001>
module attributes {stable_mosaic.version = 11 : i64} {
  func.func @linear_kernel(%arg0: memref<8x10xf32, #tpu.memory_space<vmem>>, %arg1: memref<10x128xbf16, #tpu.memory_space<vmem>>, %arg2: memref<1x128xf32, #tpu.memory_space<vmem>>, %arg3: memref<8x128xf32, #tpu.memory_space<vmem>>) attributes {dimension_semantics = [], scalar_prefetch = 0 : i64, scratch_operands = 0 : i64, tpu.core_type = #tpu.core_type<tc>} {
    %c0 = arith.constant 0 : index
    %c0_0 = arith.constant 0 : index
    %0 = vector.load %arg0[%c0, %c0_0] : memref<8x10xf32, #tpu.memory_space<vmem>>, vector<8x10xf32>
    %1 = arith.truncf %0 : vector<8x10xf32> to vector<8x10xbf16>
    %c0_1 = arith.constant 0 : index
    %c0_2 = arith.constant 0 : index
    %2 = vector.load %arg1[%c0_1, %c0_2] : memref<10x128xbf16, #tpu.memory_space<vmem>>, vector<10x128xbf16>
    %cst = arith.constant dense<0.000000e+00> : vector<8x128xf32>
    %3 = tpu.matmul %1, %2, %cst {dimension_numbers = #tpu.dot_dimension_numbers<[1], [0], [0], [1], [0, 0, 1, 1], [], []>} : vector<8x10xbf16>, vector<10x128xbf16>, vector<8x128xf32> -> vector<8x128xf32>
    %c0_3 = arith.constant 0 : index
    %c0_4 = arith.constant 0 : index
    %4 = vector.load %arg2[%c0_3, %c0_4] : memref<1x128xf32, #tpu.memory_space<vmem>>, vector<1x128xf32>
    %5 = vector.broadcast %4 : vector<1x128xf32> to vector<8x128xf32>
    %6 = arith.addf %3, %5 : vector<8x128xf32>
    %c0_5 = arith.constant 0 : index
    %c0_6 = arith.constant 0 : index
    %7 = vector.load %arg3[%c0_5, %c0_6] : memref<8x128xf32, #tpu.memory_space<vmem>>, vector<8x128xf32>
    tpu.vector_store %arg3[%c0_5, %c0_6], %6 {strides = array<i32>} : memref<8x128xf32, #tpu.memory_space<vmem>>, vector<8x128xf32>,
    return
  }
}

</mosaic_0001>

<bundles_post_ra>
// kernel: toy_model_forward.1
= control target key start
LH: loop header
LB: loop body
LE: loop exit
PB: predicated region body
PF: predicated region fallthrough
CT: control target
= control target key end

     0   :  { %8 = vsyncpa [#allocation3], 0  ;;  %s247_s0 = inlined_call_operand.hbm [shape: f32[8,10], index: 0, kind: input, shape index: {}]   ;;  %s248_s1 = inlined_call_operand.hbm [shape: bf16[10,128], index: 1, kind: input, shape index: {}]   ;;  %s249_s2 = inlined_call_operand.vmem [shape: f32[1,128], index: 2, kind: input, shape index: {}]   ;;  %s250_s3 = inlined_call_operand.hbm [shape: f32[8,128], index: 3, kind: output, shape index: {}]  }
   0x1   :  { %9 = vsyncpa [#allocation6], 0 }
   0x2   :  { %10 = vsyncpa [#allocation4], 0  ;;  %s208_s12 = smov [#allocation2]   ;;  %s209_s14 = smov [#allocation5]  }
   0x3   :  { %s17_s13 = sshll.u32 %s208_s12, 4  ;;  %s26_s15 = sshll.u32 %s209_s14, 4  ;;  %s18_s13 = int_to_ptr.vmem [resolvable:$true] %s17_s13  ;;  %s27_s15 = int_to_ptr.vmem [resolvable:$true] %s26_s15 }
   0x4   :  { %s150_s16 = scalar_lea.vmem %s18_s13, 128  ;;  %p155_p1 = scmp.lt.s32.totalorder %s18_s13, %s18_s13 }
   0x5   :  { %p151_p0 = scmp.ne.s32.totalorder %s18_s13, %s150_s16  ;;  %p156_p2 = scmp.lt.s32.totalorder %s150_s16, %s150_s16 }
   0x7   :  { %p157_p3 = por %p156_p2, %p155_p1 }
   0x9   :  { %p158_p4 = pnand %p157_p3, %p151_p0 }
   0xb   :  { %161 = shalt.err (!%p158_p4)
}
   0xc   :  { %20 = dma.hbm_to_vmem [thread:$0]  %s247_s0, 128, %s18_s13, [#allocation3]  }
   0xd   :  { %s170_s19 = scalar_lea.vmem %s27_s15, 128  ;;  %p175_p6 = scmp.lt.s32.totalorder %s27_s15, %s27_s15 }
   0xe   :  { %p171_p5 = scmp.ne.s32.totalorder %s27_s15, %s170_s19  ;;  %p176_p7 = scmp.lt.s32.totalorder %s170_s19, %s170_s19 }
  0x10   :  { %p177_p8 = por %p176_p7, %p175_p6 }
  0x12   :  { %p178_p9 = pnand %p177_p8, %p171_p5 }
  0x14   :  { %181 = shalt.err (!%p178_p9)
}
  0x15   :  { %s210_s20 = smov 64   ;;  %s211_s21 = smov 4  }
  0x16   :  { %32 = dma.hbm_to_vmem [thread:$0]  %s248_s1, 128, %s27_s15, [#allocation6], %s210_s20, %s210_s20, %s211_s21  }
  0x17   :  { %202 = dma.done.wait [#allocation3], 128  }
  0x18   :  { %203 = vsyncadd [#allocation3], 4294967168 }
  0x19   :  { %204 = dma.done.wait [#allocation6], 128  }
  0x1a   :  { %205 = vsyncadd [#allocation6], 4294967168  ;;  %v212_v0 = vmov 0.0   ;;  %vm213_vm0 = vmmov 0   ;;  %vm62_vm1 = vcmask 1044480   ;;  %v42_v2 = vld [vmem:[#allocation2] sm:$0xff] }
  0x1b   :  { %128 = vmatprep.subr.bf16.mxu0 %v212_v0  ;;  %130 = vmatprep.mubr.msk.bf16.mxu0 %vm213_vm0, %v212_v0  ;;  %v141_v1 = vld [vmem:[#allocation5] sm:$0x1f]   ;;  %v43_v4 = vpack.c.bf16 %v42_v2, %v42_v2  ;;  %vm58_vm2 = vcmask 80896   ;;  %v123_v5 = vld [vmem:[%s249_s2] ss:$0 sm:$0xff]  ;;  %s214_s1 = smov [#allocation7]  }
  0x1c   :  { %v64_v3 = vsel %vm62_vm1, %v141_v1, 0  ;;  %s113_s25 = sshll.u32 %s214_s1, 4  ;;  %s114_s25 = int_to_ptr.vmem [resolvable:$true] %s113_s25 }
  0x1d   :  { %129 = vmatpush3.bf16.msra.mxu0 %v64_v3  ;;  %s182_s26 = scalar_lea.vmem %s114_s25, 128  ;;  %p187_p11 = scmp.lt.s32.totalorder %s114_s25, %s114_s25 }
  0x1e   :  { %p183_p10 = scmp.ne.s32.totalorder %s114_s25, %s182_s26  ;;  %p188_p12 = scmp.lt.s32.totalorder %s182_s26, %s182_s26 }
  0x20   :  { %131 = vmatmul.mubr.msk.bf16.vlgmr.msra.gmra.mxu0 %vm58_vm2, %v43_v4  ;;  %p189_p13 = por %p188_p12, %p187_p11 }
  0x22   :  { %p190_p0 = pnand %p189_p13, %p183_p10 }
  0xe0   :  { %v100_v6 = vpop.f32.mrf.mxu0 }
  0xe1   :  { %v101_v7 = vadd.f32 %v123_v5, %v100_v6 }
  0xe2   :  { %v132_v8 = vpop.f32.mrf.mxu0 }
  0xe3   :  { %106 = vst [vmem:[#allocation7] sm:$0xff] %v101_v7 }
  0xe4   :  { %v103_v9 = vpop.f32.mrf.mxu0 }
  0xe5   :  { %193 = shalt.err (!%p190_p0)
}
  0xe6   :  { %116 = dma.vmem_to_hbm [thread:$0]  %s114_s25, 128, %s250_s3, [#allocation4]   ;;  %v133_v10 = vpop.f32.mrf.mxu0 }
  0xe7   :  { %206 = dma.done.wait [#allocation4], 128  }
  0xe8   :  { %207 = vsyncadd [#allocation4], 4294967168 }
  0xe9   :  { %120 = vsyncpa [#allocation3], 1 }
  0xea   :  { %121 = vsyncpa [#allocation6], 1 }
  0xeb   :  { %122 = vsyncpa [#allocation4], 1 }

</bundles_post_ra>
